<compile_context>
chip_gen: v5e
topology: v5e:2x2
jax: 0.10.0
libtpu: 0.0.40
codegen_flags: <defaults>
</compile_context>

<pallas_src>
import functools
from typing import NamedTuple

import jax
import jax.numpy as jnp
from jax.experimental import pallas as pl
from jax.experimental.pallas import tpu as pltpu


def _round_up(n: int, m: int) -> int:
    return ((n + m - 1) // m) * m


# --------------------------------------------------------------------------
# Kernel
# --------------------------------------------------------------------------
def micro_agent_kernel(x_ref, p_ref, o_ref, *, in_pad, off_b1, off_w2, off_b2,
                       h_pad, o_pad, out_size, mxu_dtype):
    # Carve the packed parameter slab with static, 8/128-aligned slices.
    w1 = p_ref[0:in_pad, 0:h_pad]                    # (in_pad, H_pad)
    b1 = p_ref[off_b1:off_b1 + 1, 0:h_pad]           # (1, H_pad)  f32
    w2 = p_ref[off_w2:off_w2 + h_pad, 0:o_pad]       # (H_pad, O_pad)
    b2 = p_ref[off_b2:off_b2 + 1, 0:o_pad]           # (1, O_pad)  f32

    x = x_ref[...]                                   # (TB, in_pad) f32

    # Linear 1 + ReLU: bf16 MXU operands, f32 accumulation, f32 elementwise.
    h = jnp.dot(x.astype(mxu_dtype), w1.astype(mxu_dtype),
                preferred_element_type=jnp.float32) + b1
    h = jnp.maximum(h, 0.0)

    # Linear 2. Store only the real output columns (narrow lane-masked store;
    # cuts the HBM writeback ~40x vs. a 128-lane padded block).
    out = jnp.dot(h.astype(mxu_dtype), w2.astype(mxu_dtype),
                  preferred_element_type=jnp.float32) + b2
    o_ref[...] = out[:, :out_size].astype(o_ref.dtype)


# --------------------------------------------------------------------------
# Parameter packing (ONE-TIME at init; hoisted out of the forward path)
# --------------------------------------------------------------------------
class SlabMeta(NamedTuple):
    in_pad: int
    off_b1: int
    off_w2: int
    off_b2: int
    h_pad: int
    o_pad: int
    out_size: int


def pack_params(w1, b1, w2, b2):
    """Pack (W1, b1, W2, b2) into one f32 slab with 8-aligned row offsets.

    W1 is (in, H), b1 is (H,), W2 is (H, O), b2 is (O,). Hidden/output lane
    widths are zero-padded to multiples of 128 and W1's row count to a
    multiple of 8 so every in-kernel view is a zero-cost aligned slice.
    Zero padding is exact: padded hidden lanes are 0 -> ReLU(0)=0 ->
    contribute nothing; padded output lanes are never stored.
    """
    in_size, hidden = w1.shape
    out_size = w2.shape[1]
    in_pad = _round_up(in_size, 8)
    h_pad = _round_up(max(hidden, 128), 128)
    o_pad = _round_up(max(out_size, 128), 128)
    width = max(h_pad, o_pad)

    off_b1 = in_pad                 # already a multiple of 8
    off_w2 = off_b1 + 8
    off_b2 = off_w2 + h_pad
    rows = off_b2 + 8

    slab = jnp.zeros((rows, width), jnp.float32)
    slab = slab.at[0:in_size, :hidden].set(w1.astype(jnp.float32))
    slab = slab.at[off_b1, :hidden].set(b1.reshape(-1).astype(jnp.float32))
    slab = slab.at[off_w2:off_w2 + hidden, :out_size].set(w2.astype(jnp.float32))
    slab = slab.at[off_b2, :out_size].set(b2.reshape(-1).astype(jnp.float32))

    meta = SlabMeta(in_pad=in_pad, off_b1=off_b1, off_w2=off_w2, off_b2=off_b2,
                    h_pad=h_pad, o_pad=o_pad, out_size=out_size)
    return slab, meta


# --------------------------------------------------------------------------
# Batch tiling: minimal row padding, big tiles, prefer even grid (v7x 2 TCs)
# --------------------------------------------------------------------------
def _choose_batch_tiling(B: int, block_b: int):
    """Return (b_pad, tb) with tb % 8 == 0 and b_pad % tb == 0."""
    block_b = max(8, _round_up(block_b, 8))
    b8 = _round_up(B, 8)
    if b8 <= block_b:
        # Two balanced steps if cleanly splittable (keeps both v7x TCs busy).
        if b8 % 16 == 0 and b8 >= 16:
            return b8, b8 // 2
        return b8, b8

    n8 = b8 // 8
    g_min = -(-b8 // block_b)          # ceil(b8 / block_b)
    best = None
    for g in range(g_min, n8 + 1):
        if best is not None and g > 2 * best[0]:
            break
        if n8 % g != 0:
            continue
        tb = b8 // g
        if best is None:
            best = (g, tb)
            if g % 2 == 0:
                break
        elif g % 2 == 0:
            best = (g, tb)
            break

    # Fallback: only pad B up to a multiple of block_b when exact divisors
    # would force tiny tiles (per-step overhead would dominate).
    if best is None or best[1] < max(64, block_b // 8):
        return _round_up(B, block_b), block_b
    return b8, best[1]


# --------------------------------------------------------------------------
# Forward wrapper (jit'ed; slab packed once outside)
# --------------------------------------------------------------------------
@functools.partial(jax.jit, static_argnames=("meta", "block_b", "mxu_dtype"))
def micro_agent_forward(x, slab, meta, *, block_b=1024,
                        mxu_dtype=jnp.bfloat16):
    """x: (B, input_size) f32. Returns (B, output_size) f32."""
    B, in_size = x.shape
    x = x.astype(jnp.float32)

    # Feature padding to the slab's 8-aligned W1 row count (no-op if aligned).
    if in_size != meta.in_pad:
        x = jnp.pad(x, ((0, 0), (0, meta.in_pad - in_size)))

    b_pad, tb = _choose_batch_tiling(B, block_b)
    if b_pad != B:
        x = jnp.pad(x, ((0, b_pad - B), (0, 0)))

    kernel = functools.partial(
        micro_agent_kernel,
        in_pad=meta.in_pad, off_b1=meta.off_b1, off_w2=meta.off_w2,
        off_b2=meta.off_b2, h_pad=meta.h_pad, o_pad=meta.o_pad,
        out_size=meta.out_size, mxu_dtype=mxu_dtype)

    flops = 2 * b_pad * (meta.in_pad * meta.h_pad + meta.h_pad * meta.o_pad)
    bytes_accessed = 4 * (b_pad * meta.in_pad + b_pad * meta.out_size
                          + slab.shape[0] * slab.shape[1])
    cost = pl.CostEstimate(flops=flops, transcendentals=0,
                           bytes_accessed=bytes_accessed)

    out = pl.pallas_call(
        kernel,
        out_shape=jax.ShapeDtypeStruct((b_pad, meta.out_size), jnp.float32),
        grid=(b_pad // tb,),
        in_specs=[
            # x tile: streamed / double-buffered over the batch grid.
            pl.BlockSpec((tb, meta.in_pad), lambda i: (i, 0)),
            # packed params: same block every step -> resident in VMEM.
            pl.BlockSpec(slab.shape, lambda i: (0, 0)),
        ],
        # Unpadded output: block last dim == full array dim (legal), so the
        # HBM writeback is only the real columns.
        out_specs=pl.BlockSpec((tb, meta.out_size), lambda i: (i, 0)),
        compiler_params=pltpu.CompilerParams(
            dimension_semantics=("parallel",)),
        cost_estimate=cost,
    )(x, slab)

    return out if b_pad == B else out[:B]


# --------------------------------------------------------------------------
# Init (mirrors torch.nn.Linear default U[-1/sqrt(fan_in), +1/sqrt(fan_in)])
# --------------------------------------------------------------------------
def init_params(key, input_size, hidden_size=64, output_size=3):
    k1, k2, k3, k4 = jax.random.split(key, 4)
    bound1 = 1.0 / jnp.sqrt(float(input_size))
    bound2 = 1.0 / jnp.sqrt(float(hidden_size))
    # Stored as (in_features, out_features) — transpose of PyTorch's layout.
    w1 = jax.random.uniform(k1, (input_size, hidden_size), jnp.float32, -bound1, bound1)
    b1 = jax.random.uniform(k2, (hidden_size,), jnp.float32, -bound1, bound1)
    w2 = jax.random.uniform(k3, (hidden_size, output_size), jnp.float32, -bound2, bound2)
    b2 = jax.random.uniform(k4, (output_size,), jnp.float32, -bound2, bound2)
    return w1, b1, w2, b2


def _reference(x, w1, b1, w2, b2):
    return jnp.maximum(x @ w1 + b1[None, :], 0.0) @ w2 + b2[None, :]


if __name__ == "__main__":
    key = jax.random.PRNGKey(0)
    kp, kx1, kx2, kx3, kx4 = jax.random.split(key, 5)

    input_size, hidden_size, output_size = 32, 64, 3
    w1, b1, w2, b2 = init_params(kp, input_size, hidden_size, output_size)
    slab, meta = pack_params(w1, b1, w2, b2)   # packed ONCE, reused below

    def ref(x):
        return _reference(x, w1, b1, w2, b2)

    # 1) Small single-tile batch, exact f32 MXU path (tight tolerance).
    x = jax.random.normal(kx1, (8, input_size), jnp.float32)
    out = jax.block_until_ready(
        micro_agent_forward(x, slab, meta, mxu_dtype=jnp.float32))
    assert out.shape == (8, output_size)
    assert jnp.allclose(out, ref(x), atol=1e-5, rtol=1e-5)

    # 2) Same batch, default bf16-operand MXU fast path.
    out = jax.block_until_ready(micro_agent_forward(x, slab, meta))
    assert jnp.allclose(out, ref(x), atol=2e-2, rtol=0)

    # 3) Batch not a multiple of 8 (minimal row padding + tail slice).
    x = jax.random.normal(kx2, (37, input_size), jnp.float32)
    out = jax.block_until_ready(micro_agent_forward(x, slab, meta))
    assert out.shape == (37, output_size)
    assert jnp.allclose(out, ref(x), atol=2e-2, rtol=0)

    # 4) Multi-step grid with zero row padding (B=520 -> tb=104, 5 steps).
    x = jax.random.normal(kx3, (520, input_size), jnp.float32)
    out = jax.block_until_ready(micro_agent_forward(x, slab, meta, block_b=128))
    assert out.shape == (520, output_size)
    assert jnp.allclose(out, ref(x), atol=2e-2, rtol=0)

    # 5) Larger batch, even grid (2 balanced steps of 1024) — default block_b.
    x = jax.random.normal(kx4, (2048, input_size), jnp.float32)
    out = jax.block_until_ready(micro_agent_forward(x, slab, meta))
    assert out.shape == (2048, output_size)
    assert jnp.allclose(out, ref(x), atol=2e-2, rtol=0)

    print("KERNEL_OK")
</pallas_src>

<mosaic_0001>
module attributes {stable_mosaic.version = 11 : i64} {
  func.func @micro_agent_kernel(%arg0: i32, %arg1: memref<8x32xf32, #tpu.memory_space<vmem>>, %arg2: memref<176x128xf32, #tpu.memory_space<vmem>>, %arg3: memref<8x3xf32, #tpu.memory_space<vmem>>) attributes {dimension_semantics = [#tpu.dimension_semantics<parallel>], iteration_bounds = array<i64: 1>, scalar_prefetch = 0 : i64, scratch_operands = 0 : i64, tpu.core_type = #tpu.core_type<tc>, window_params = [{transform_indices = @transform_0, window_bounds = array<i64: 8, 32>}, {pipeline_mode = #tpu.pipeline_mode<synchronous>, transform_indices = @transform_1, window_bounds = array<i64: 176, 128>}, {transform_indices = @transform_2, window_bounds = array<i64: 8, 3>}]} {
    %c0 = arith.constant 0 : index
    %c0_0 = arith.constant 0 : index
    %0 = vector.load %arg2[%c0, %c0_0] : memref<176x128xf32, #tpu.memory_space<vmem>>, vector<32x128xf32>
    %c32 = arith.constant 32 : index
    %c0_1 = arith.constant 0 : index
    %1 = vector.load %arg2[%c32, %c0_1] : memref<176x128xf32, #tpu.memory_space<vmem>>, vector<1x128xf32>
    %c40 = arith.constant 40 : index
    %c0_2 = arith.constant 0 : index
    %2 = vector.load %arg2[%c40, %c0_2] : memref<176x128xf32, #tpu.memory_space<vmem>>, vector<128x128xf32>
    %c168 = arith.constant 168 : index
    %c0_3 = arith.constant 0 : index
    %3 = vector.load %arg2[%c168, %c0_3] : memref<176x128xf32, #tpu.memory_space<vmem>>, vector<1x128xf32>
    %c0_4 = arith.constant 0 : index
    %c0_5 = arith.constant 0 : index
    %4 = vector.load %arg1[%c0_4, %c0_5] : memref<8x32xf32, #tpu.memory_space<vmem>>, vector<8x32xf32>
    %cst = arith.constant dense<0.000000e+00> : vector<8x128xf32>
    %5 = tpu.matmul %4, %0, %cst {dimension_numbers = #tpu.dot_dimension_numbers<[1], [0], [0], [1], [0, 0, 1, 1], [], []>} : vector<8x32xf32>, vector<32x128xf32>, vector<8x128xf32> -> vector<8x128xf32>
    %6 = vector.broadcast %1 : vector<1x128xf32> to vector<8x128xf32>
    %7 = arith.addf %5, %6 : vector<8x128xf32>
    %cst_6 = arith.constant 0.000000e+00 : f32
    %8 = vector.broadcast %cst_6 : f32 to vector<8x128xf32>
    %9 = arith.maximumf %7, %8 : vector<8x128xf32>
    %cst_7 = arith.constant dense<0.000000e+00> : vector<8x128xf32>
    %10 = tpu.matmul %9, %2, %cst_7 {dimension_numbers = #tpu.dot_dimension_numbers<[1], [0], [0], [1], [0, 0, 1, 1], [], []>} : vector<8x128xf32>, vector<128x128xf32>, vector<8x128xf32> -> vector<8x128xf32>
    %11 = vector.broadcast %3 : vector<1x128xf32> to vector<8x128xf32>
    %12 = arith.addf %10, %11 : vector<8x128xf32>
    %13 = vector.extract_strided_slice %12 {offsets = [0, 0], sizes = [8, 3], strides = [1, 1]} : vector<8x128xf32> to vector<8x3xf32>
    %c0_8 = arith.constant 0 : index
    %c0_9 = arith.constant 0 : index
    %14 = vector.load %arg3[%c0_8, %c0_9] : memref<8x3xf32, #tpu.memory_space<vmem>>, vector<8x3xf32>
    tpu.vector_store %arg3[%c0_8, %c0_9], %13 {strides = array<i32>} : memref<8x3xf32, #tpu.memory_space<vmem>>, vector<8x3xf32>,
    return
  }
  func.func @transform_0(%arg0: i32) -> (i32, i32) {
    %c0_i32 = arith.constant 0 : i32
    %c0_i32_0 = arith.constant 0 : i32
    return %arg0, %c0_i32 : i32, i32
  }
  func.func @transform_1(%arg0: i32) -> (i32, i32) {
    %c0_i32 = arith.constant 0 : i32
    %c0_i32_0 = arith.constant 0 : i32
    %c0_i32_1 = arith.constant 0 : i32
    return %c0_i32, %c0_i32_0 : i32, i32
  }
  func.func @transform_2(%arg0: i32) -> (i32, i32) {
    %c0_i32 = arith.constant 0 : i32
    %c0_i32_0 = arith.constant 0 : i32
    return %arg0, %c0_i32 : i32, i32
  }
}

</mosaic_0001>

<bundles_post_ra>
// kernel: micro_agent_forward.1
= control target key start
LH: loop header
LB: loop body
LE: loop exit
PB: predicated region body
PF: predicated region fallthrough
CT: control target
= control target key end

     0   :  { %7 = vsyncpa [#allocation3], 0  ;;  %s206_s0 = inlined_call_operand.hbm [shape: f32[8,32], index: 0, kind: input, shape index: {}]   ;;  %s207_s1 = inlined_call_operand.hbm [shape: f32[176,128], index: 1, kind: input, shape index: {}]   ;;  %s208_s2 = inlined_call_operand.vmem [shape: f32[8,3], index: 2, kind: output, shape index: {}]  }
   0x1   :  { %s14_s11 = sshll.u32 %s206_s0, 4  ;;  %s15_s11 = int_to_ptr.hbm [resolvable:$true] %s14_s11 }
   0x2   :  { %8 = vsyncpa [#allocation5], 0  ;;  %s178_s12 = smov [#allocation2]   ;;  %s24_s16 = sshll.u32 %s207_s1, 4  ;;  %s25_s16 = int_to_ptr.hbm [resolvable:$true] %s24_s16 }
   0x3   :  { %s16_s13 = sshll.u32 %s178_s12, 4  ;;  %s179_s17 = smov [#allocation4]   ;;  %s17_s13 = int_to_ptr.vmem [resolvable:$true] %s16_s13 }
   0x4   :  { %19 = dma.hbm_to_vmem [thread:$0]  %s15_s11, 128, %s17_s13, [#allocation3]  }
   0x5   :  { %s26_s18 = sshll.u32 %s179_s17, 4  ;;  %s180_s19 = smov 128   ;;  %s27_s18 = int_to_ptr.vmem [resolvable:$true] %s26_s18 }
   0x6   :  { %s181_s20 = smov 8  }
   0x7   :  { %32 = dma.hbm_to_vmem [thread:$0]  %s25_s16, 2816, %s27_s18, [#allocation5], %s180_s19, %s180_s19, %s181_s20  }
   0x8   :  { %174 = dma.done.wait [#allocation3], 128  }
   0x9   :  { %175 = vsyncadd [#allocation3], 4294967168 }
   0xa   :  { %176 = dma.done.wait [#allocation5], 2816  }
   0xb   :  { %177 = vsyncadd [#allocation5], 4294964480  ;;  %v44_v0 = vld [vmem:[#allocation4 + $0x18] sm:$0xff]  ;;  %v43_v1 = vld [vmem:[#allocation4 + $0x10] sm:$0xff]  ;;  %vm65_vm0 = vcmask 261120   ;;  %vm111_vm1 = vcmask 23552  }
   0xc   :  { %81 = vmatpush.msra.mxu0 %v44_v0  ;;  %v61_v2 = vld [vmem:[#allocation4 + $0xa0] sm:$0xff]  ;;  %v42_v3 = vld [vmem:[#allocation4 + $0x8] sm:$0xff]  ;;  %v60_v4 = vld [vmem:[#allocation4 + $0x98] sm:$0xff] }
   0xd   :  { %91 = vmatpush.msra.mxu1 %v61_v2  ;;  %v59_v5 = vld [vmem:[#allocation4 + $0x90] sm:$0xff]  ;;  %v41_v6 = vld [vmem:[#allocation4] sm:$0xff]  ;;  %v63_v7 = vld [vmem:[#allocation2] sm:$0xff] }
   0xe   :  { %82 = vmatpush.msra.mxu0 %v43_v1  ;;  %v58_v8 = vld [vmem:[#allocation4 + $0x88] sm:$0xff]  ;;  %v57_v9 = vld [vmem:[#allocation4 + $0x80] sm:$0xff]  ;;  %v56_v10 = vld [vmem:[#allocation4 + $0x78] sm:$0xff] }
   0xf   :  { %92 = vmatpush.msra.mxu1 %v60_v4  ;;  %v55_v11 = vld [vmem:[#allocation4 + $0x70] sm:$0xff]  ;;  %v54_v12 = vld [vmem:[#allocation4 + $0x68] sm:$0xff]  ;;  %v53_v13 = vld [vmem:[#allocation4 + $0x60] sm:$0xff] }
  0x10   :  { %83 = vmatpush.msra.mxu0 %v42_v3  ;;  %v52_v14 = vld [vmem:[#allocation4 + $0x58] sm:$0xff]  ;;  %v51_v15 = vld [vmem:[#allocation4 + $0x50] sm:$0xff]  ;;  %v50_v16 = vld [vmem:[#allocation4 + $0x48] sm:$0xff] }
  0x11   :  { %93 = vmatpush.msra.mxu1 %v59_v5  ;;  %v49_v17 = vld [vmem:[#allocation4 + $0x40] sm:$0xff]  ;;  %v48_v18 = vld [vmem:[#allocation4 + $0x38] sm:$0xff]  ;;  %v47_v19 = vld [vmem:[#allocation4 + $0x30] sm:$0xff] }
  0x12   :  { %84 = vmatpush.msra.mxu0 %v41_v6  ;;  %v46_v20 = vld [vmem:[#allocation4 + $0x28] sm:$0xff]  ;;  %v124_v21 = vld [vmem:[#allocation4 + $0x20] ss:$0 sm:$0xff] }
  0x13   :  { %119 = vmatmul.msk.f32.vlgmr.msra.gmra.mxu0 %vm65_vm0, %v63_v7  ;;  %94 = vmatpush.msra.mxu1 %v58_v8  ;;  %v125_v25 = vld [vmem:[#allocation4 + $0xa8] ss:$0 sm:$0xff] }
  0x15   :  { %95 = vmatpush.msra.mxu1 %v57_v9 }
  0x17   :  { %96 = vmatpush.msra.mxu1 %v56_v10 }
  0x19   :  { %97 = vmatpush.msra.mxu1 %v55_v11 }
  0x1b   :  { %98 = vmatpush.msra.mxu1 %v54_v12 }
  0x1d   :  { %99 = vmatpush.msra.mxu1 %v53_v13 }
  0x1f   :  { %100 = vmatpush.msra.mxu1 %v52_v14 }
  0x21   :  { %101 = vmatpush.msra.mxu1 %v51_v15 }
  0x23   :  { %102 = vmatpush.msra.mxu1 %v50_v16 }
  0x25   :  { %103 = vmatpush.msra.mxu1 %v49_v17 }
  0x27   :  { %104 = vmatpush.msra.mxu1 %v48_v18 }
  0x29   :  { %105 = vmatpush.msra.mxu1 %v47_v19 }
  0x2b   :  { %106 = vmatpush.msra.mxu1 %v46_v20 }
  0x90   :  { %v86_v22 = vpop.f32.mrf.mxu0 }
  0x91   :  { %v87_v23 = vadd.f32 %v124_v21, %v86_v22 }
  0x93   :  { %v89_v24 = vmax.f32 %v87_v23, 0.0 }
  0x95   :  { %107 = vmatmul.f32.vlgmr.msra.gmra.mxu1 %v89_v24 }
 0x112   :  { %v108_v26 = vpop.f32.mrf.mxu1 }
 0x113   :  { %v109_v27 = vadd.f32 %v125_v25, %v108_v26 }
 0x115   :  { %112 = vst.msk [vmem:[%s208_s2] sm:$0xff] %vm111_vm1, %v109_v27 }
 0x116   :  { %117 = vsyncpa [#allocation3], 1 }
 0x117   :  { %118 = vsyncpa [#allocation5], 1 }

</bundles_post_ra>
